<compile_context>
chip_gen: v7x
topology: tpu7x:2x2x1
jax: 0.10.0
libtpu: 0.0.40
codegen_flags: <defaults>
</compile_context>

<pallas_src>
import functools

import jax
import jax.numpy as jnp
from jax.experimental import pallas as pl
from jax.experimental.pallas import tpu as pltpu

_BN_EPS = 1e-5
# Safe on every generation: v7x has only 64 MiB physical VMEM per TensorCore.
_VMEM_LIMIT = 48 * 1024 * 1024
_VMEM_SPEC = pl.BlockSpec(memory_space=pltpu.MemorySpace.VMEM)


def _round_up(x, m):
    return (x + m - 1) // m * m


# ----------------------------- Pallas kernels ------------------------------

def _conv_bn_kernel(p_ref, w_ref, sh_ref, o_ref, *, relu):
    # (tm, K) @ (K, tn) on the MXU (bf16 in, f32 accumulate), + folded-BN shift.
    acc = jnp.dot(p_ref[...], w_ref[...], preferred_element_type=jnp.float32)
    acc = acc + sh_ref[...]
    if relu:
        acc = jnp.maximum(acc, 0.0)
    o_ref[...] = acc.astype(o_ref.dtype)


def _conv_bn_res_kernel(p_ref, w_ref, sh_ref, res_ref, o_ref, *, relu):
    # Same as above but fuses the residual add of a BasicBlock.
    acc = jnp.dot(p_ref[...], w_ref[...], preferred_element_type=jnp.float32)
    acc = acc + sh_ref[...] + res_ref[...].astype(jnp.float32)
    if relu:
        acc = jnp.maximum(acc, 0.0)
    o_ref[...] = acc.astype(o_ref.dtype)


def _maxpool_kernel(p_ref, o_ref):
    # p_ref: (kh*kw, tm, C) window-stacked patches; reduce max over the windows.
    o_ref[...] = jnp.max(p_ref[...], axis=0)


def _avgpool_kernel(x_ref, o_ref, *, inv):
    # x_ref: (N, H*W, C); global average over the spatial axis, f32 accumulate.
    o_ref[...] = jnp.sum(x_ref[...].astype(jnp.float32), axis=1) * inv


# ------------------------------ Pallas wrappers -----------------------------

def _conv_bn_act(patches, w_flat, shift, residual, relu,
                 out_dtype=jnp.bfloat16):
    """Tiled fused matmul + BN-shift (+ residual) (+ ReLU).

    patches : (M, K)        bf16
    w_flat  : (K, Co_pad)   bf16   (BN scale already folded in; Co_pad % 128 == 0)
    shift   : (1, Co_pad)   f32
    residual: (M, Co_pad)   bf16 or None
    """
    m, k = patches.shape
    co = w_flat.shape[1]

    tn = min(co, 256)
    tm = 512 if m >= 512 else _round_up(m, 8)
    m_pad = _round_up(m, tm)
    if m_pad != m:
        patches = jnp.pad(patches, ((0, m_pad - m), (0, 0)))
        if residual is not None:
            residual = jnp.pad(residual, ((0, m_pad - m), (0, 0)))

    # Co is the outer (slow) grid axis -> weight block constant over inner M loop.
    grid = (co // tn, m_pad // tm)

    in_specs = [
        pl.BlockSpec((tm, k), lambda j, i: (i, 0)),
        pl.BlockSpec((k, tn), lambda j, i: (0, j)),
        pl.BlockSpec((1, tn), lambda j, i: (0, j)),
    ]
    args = [patches, w_flat, shift]
    if residual is None:
        kern = functools.partial(_conv_bn_kernel, relu=relu)
    else:
        in_specs.append(pl.BlockSpec((tm, tn), lambda j, i: (i, j)))
        args.append(residual)
        kern = functools.partial(_conv_bn_res_kernel, relu=relu)

    out = pl.pallas_call(
        kern,
        out_shape=jax.ShapeDtypeStruct((m_pad, co), out_dtype),
        grid_spec=pltpu.PrefetchScalarGridSpec(
            num_scalar_prefetch=0,
            grid=grid,
            in_specs=in_specs,
            out_specs=pl.BlockSpec((tm, tn), lambda j, i: (i, j)),
        ),
        compiler_params=pltpu.CompilerParams(
            dimension_semantics=("parallel", "parallel"),
            vmem_limit_bytes=_VMEM_LIMIT),
    )(*args)
    return out[:m]


def _im2col(x, kh, kw, stride, pad):
    # x: NHWC (bf16).  Returns (N*oh*ow, kh*kw*C) with rows in (N, oh, ow)
    # order and columns in ((kh, kw), C) order.
    n, h, w, c = x.shape
    xp = jnp.pad(x, ((0, 0), (pad, pad), (pad, pad), (0, 0)))
    oh = (h + 2 * pad - kh) // stride + 1
    ow = (w + 2 * pad - kw) // stride + 1
    cols = []
    for i in range(kh):
        for j in range(kw):
            cols.append(xp[:, i:i + stride * oh:stride,
                           j:j + stride * ow:stride, :])
    p = jnp.stack(cols, axis=3)  # (N, oh, ow, kh*kw, C)
    return p.reshape(n * oh * ow, kh * kw * c), oh, ow


def _fold_bn(bn):
    scale = bn["gamma"] / jnp.sqrt(bn["var"] + _BN_EPS)
    shift = bn["beta"] - bn["mean"] * scale
    return scale, shift


def _conv_bn(x, w, bn, stride, pad, relu, residual=None):
    # x: NHWC bf16, w: PyTorch layout (Cout, Cin, kh, kw), bias-free.
    cout, cin, kh, kw = w.shape
    patches, oh, ow = _im2col(x, kh, kw, stride, pad)

    scale, shift = _fold_bn(bn)
    w_flat = jnp.transpose(w, (2, 3, 1, 0)).reshape(kh * kw * cin, cout)
    w_flat = w_flat * scale[None, :]          # fold BN scale into the weights

    # Pad Co to a multiple of 128 lanes so output stores are unmasked.
    co_pad = _round_up(cout, 128)
    if co_pad != cout:
        w_flat = jnp.pad(w_flat, ((0, 0), (0, co_pad - cout)))
        shift = jnp.pad(shift, ((0, co_pad - cout),))
    w_flat = w_flat.astype(jnp.bfloat16)
    shift2 = shift.reshape(1, co_pad).astype(jnp.float32)

    res_flat = None
    if residual is not None:
        res_flat = residual.reshape(-1, cout).astype(jnp.bfloat16)
        if co_pad != cout:
            res_flat = jnp.pad(res_flat, ((0, 0), (0, co_pad - cout)))

    out = _conv_bn_act(patches.astype(jnp.bfloat16), w_flat, shift2,
                       res_flat, relu)
    return out[:, :cout].reshape(x.shape[0], oh, ow, cout)


def _maxpool_3x3_s2(x):
    n, h, w, c = x.shape
    k, s, pad = 3, 2, 1
    xp = jnp.pad(x, ((0, 0), (pad, pad), (pad, pad), (0, 0)),
                 constant_values=-jnp.inf)
    oh = (h + 2 * pad - k) // s + 1
    ow = (w + 2 * pad - k) // s + 1
    cols = []
    for i in range(k):
        for j in range(k):
            cols.append(xp[:, i:i + s * oh:s, j:j + s * ow:s, :])
    p = jnp.stack(cols, axis=0).reshape(k * k, n * oh * ow, c)

    m = n * oh * ow
    tm = 1024 if m >= 1024 else _round_up(m, 8)
    m_pad = _round_up(m, tm)
    if m_pad != m:
        p = jnp.pad(p, ((0, 0), (0, m_pad - m), (0, 0)))

    out = pl.pallas_call(
        _maxpool_kernel,
        out_shape=jax.ShapeDtypeStruct((m_pad, c), x.dtype),
        grid_spec=pltpu.PrefetchScalarGridSpec(
            num_scalar_prefetch=0,
            grid=(m_pad // tm,),
            in_specs=[pl.BlockSpec((k * k, tm, c), lambda i: (0, i, 0))],
            out_specs=pl.BlockSpec((tm, c), lambda i: (i, 0)),
        ),
        compiler_params=pltpu.CompilerParams(
            dimension_semantics=("parallel",),
            vmem_limit_bytes=_VMEM_LIMIT),
    )(p)
    return out[:m].reshape(n, oh, ow, c)


def _global_avgpool(x):
    # Keep lanes (C) dense and sublanes (HW) full: reduce (N, HW, C) over axis 1.
    n, h, w, c = x.shape
    p = x.reshape(n, h * w, c)
    kern = functools.partial(_avgpool_kernel, inv=1.0 / (h * w))
    return pl.pallas_call(
        kern,
        out_shape=jax.ShapeDtypeStruct((n, c), jnp.float32),
        in_specs=[_VMEM_SPEC],
        out_specs=_VMEM_SPEC,
        compiler_params=pltpu.CompilerParams(vmem_limit_bytes=_VMEM_LIMIT),
    )(p)


# ------------------------------- model graph --------------------------------

def _basic_block(x, blk):
    identity = x
    out = _conv_bn(x, blk["conv1_w"], blk["bn1"], blk["stride"], 1, relu=True)
    if "down_w" in blk:  # 1x1 stride-s downsample branch
        identity = _conv_bn(x, blk["down_w"], blk["down_bn"], blk["stride"], 0,
                            relu=False)
    out = _conv_bn(out, blk["conv2_w"], blk["bn2"], 1, 1, relu=True,
                   residual=identity)
    return out


def feature_extractor(params, x_nchw):
    """ResNet-18 children()[:-1]: conv1/bn1/relu/maxpool/layer1-4/avgpool."""
    x = jnp.transpose(x_nchw, (0, 2, 3, 1)).astype(jnp.bfloat16)  # NCHW->NHWC
    x = _conv_bn(x, params["conv1_w"], params["bn1"], stride=2, pad=3, relu=True)
    x = _maxpool_3x3_s2(x)
    for blocks in params["layers"]:
        for blk in blocks:
            x = _basic_block(x, blk)
    feat = _global_avgpool(x)                       # (N, 512) f32
    return feat.reshape(x.shape[0], 512, 1, 1)      # NCHW like PyTorch output


# ---------------------------- deterministic init ----------------------------

def _init_conv(key, cout, cin, kh, kw):
    fan_in = cin * kh * kw
    return jax.random.normal(key, (cout, cin, kh, kw), jnp.float32) * (
        (2.0 / fan_in) ** 0.5)


def _init_bn(key, c):
    k1, k2, k3, k4 = jax.random.split(key, 4)
    return dict(
        gamma=1.0 + 0.1 * jax.random.normal(k1, (c,), jnp.float32),
        beta=0.05 * jax.random.normal(k2, (c,), jnp.float32),
        mean=0.05 * jax.random.normal(k3, (c,), jnp.float32),
        var=1.0 + 0.1 * jax.random.uniform(k4, (c,), jnp.float32),
    )


def init_resnet18_params(key):
    keys = iter(jax.random.split(key, 256))
    params = {
        "conv1_w": _init_conv(next(keys), 64, 3, 7, 7),
        "bn1": _init_bn(next(keys), 64),
    }
    cfg = [(64, 64, 1), (64, 128, 2), (128, 256, 2), (256, 512, 2)]
    layers = []
    for cin, cout, stride in cfg:
        blocks = []
        for b in range(2):
            s = stride if b == 0 else 1
            ci = cin if b == 0 else cout
            blk = {
                "stride": s,
                "conv1_w": _init_conv(next(keys), cout, ci, 3, 3),
                "bn1": _init_bn(next(keys), cout),
                "conv2_w": _init_conv(next(keys), cout, cout, 3, 3),
                "bn2": _init_bn(next(keys), cout),
            }
            if s != 1 or ci != cout:
                blk["down_w"] = _init_conv(next(keys), cout, ci, 1, 1)
                blk["down_bn"] = _init_bn(next(keys), cout)
            blocks.append(blk)
        layers.append(blocks)
    params["layers"] = layers
    return params


# ----------------------------------- main ------------------------------------

if __name__ == "__main__":
    key = jax.random.PRNGKey(0)
    pkey, xkey = jax.random.split(key)
    params = init_resnet18_params(pkey)

    # Small NCHW input (3 channels required by ResNet-18's conv1).
    x = jax.random.normal(xkey, (2, 3, 32, 32), jnp.float32)

    out = feature_extractor(params, x)
    out = jax.block_until_ready(out)

    assert out.shape == (2, 512, 1, 1), out.shape
    assert out.dtype == jnp.float32
    assert bool(jnp.all(jnp.isfinite(out)))
    print("KERNEL_OK")
</pallas_src>

<mosaic_0001>
module attributes {stable_mosaic.version = 11 : i64} {
  func.func @_conv_bn_kernel(%arg0: i32, %arg1: i32, %arg2: memref<512x147xbf16, #tpu.memory_space<vmem>>, %arg3: memref<147x128xbf16, #tpu.memory_space<vmem>>, %arg4: memref<1x128xf32, #tpu.memory_space<vmem>>, %arg5: memref<512x128xbf16, #tpu.memory_space<vmem>>) attributes {dimension_semantics = [#tpu.dimension_semantics<parallel>, #tpu.dimension_semantics<parallel>], iteration_bounds = array<i64: 1, 1>, scalar_prefetch = 0 : i64, scratch_operands = 0 : i64, tpu.core_type = #tpu.core_type<tc>, window_params = [{transform_indices = @transform_0, window_bounds = array<i64: 512, 147>}, {transform_indices = @transform_1, window_bounds = array<i64: 147, 128>}, {transform_indices = @transform_2, window_bounds = array<i64: 1, 128>}, {transform_indices = @transform_3, window_bounds = array<i64: 512, 128>}]} {
    %c0 = arith.constant 0 : index
    %c0_0 = arith.constant 0 : index
    %0 = vector.load %arg2[%c0, %c0_0] : memref<512x147xbf16, #tpu.memory_space<vmem>>, vector<512x147xbf16>
    %c0_1 = arith.constant 0 : index
    %c0_2 = arith.constant 0 : index
    %1 = vector.load %arg3[%c0_1, %c0_2] : memref<147x128xbf16, #tpu.memory_space<vmem>>, vector<147x128xbf16>
    %cst = arith.constant dense<0.000000e+00> : vector<512x128xf32>
    %2 = tpu.matmul %0, %1, %cst {dimension_numbers = #tpu.dot_dimension_numbers<[1], [0], [0], [1], [0, 0, 1, 1], [], []>} : vector<512x147xbf16>, vector<147x128xbf16>, vector<512x128xf32> -> vector<512x128xf32>
    %c0_3 = arith.constant 0 : index
    %c0_4 = arith.constant 0 : index
    %3 = vector.load %arg4[%c0_3, %c0_4] : memref<1x128xf32, #tpu.memory_space<vmem>>, vector<1x128xf32>
    %4 = vector.broadcast %3 : vector<1x128xf32> to vector<512x128xf32>
    %5 = arith.addf %2, %4 : vector<512x128xf32>
    %cst_5 = arith.constant 0.000000e+00 : f32
    %6 = vector.broadcast %cst_5 : f32 to vector<512x128xf32>
    %7 = arith.maximumf %5, %6 : vector<512x128xf32>
    %8 = arith.truncf %7 : vector<512x128xf32> to vector<512x128xbf16>
    %c0_6 = arith.constant 0 : index
    %c0_7 = arith.constant 0 : index
    %9 = vector.load %arg5[%c0_6, %c0_7] : memref<512x128xbf16, #tpu.memory_space<vmem>>, vector<512x128xbf16>
    tpu.vector_store %arg5[%c0_6, %c0_7], %8 {strides = array<i32>} : memref<512x128xbf16, #tpu.memory_space<vmem>>, vector<512x128xbf16>,
    return
  }
  func.func @transform_0(%arg0: i32, %arg1: i32) -> (i32, i32) {
    %c0_i32 = arith.constant 0 : i32
    %c0_i32_0 = arith.constant 0 : i32
    return %arg1, %c0_i32 : i32, i32
  }
  func.func @transform_1(%arg0: i32, %arg1: i32) -> (i32, i32) {
    %c0_i32 = arith.constant 0 : i32
    %c0_i32_0 = arith.constant 0 : i32
    return %c0_i32, %arg0 : i32, i32
  }
  func.func @transform_2(%arg0: i32, %arg1: i32) -> (i32, i32) {
    %c0_i32 = arith.constant 0 : i32
    %c0_i32_0 = arith.constant 0 : i32
    return %c0_i32, %arg0 : i32, i32
  }
  func.func @transform_3(%arg0: i32, %arg1: i32) -> (i32, i32) {
    %c0_i32 = arith.constant 0 : i32
    return %arg1, %arg0 : i32, i32
  }
}

</mosaic_0001>

<bundles_post_ra>
// kernel: tpu_custom_call.1
= control target key start
LH: loop header
LB: loop body
LE: loop exit
PB: predicated region body
PF: predicated region fallthrough
CT: control target
= control target key end

     0   :  { %v1825_v1 = vmov 0   ;;  %vm451_vm0 = vcmask 154624   ;;  %vm548_vm1 = vcmask 1040384   ;;  %vm549_vm2 = vcmask 1041408   ;;  %s2185_s0 = inlined_call_operand.vmem [shape: bf16[512,147], index: 0, kind: input, shape index: {}]   ;;  %s2186_s1 = inlined_call_operand.vmem [shape: bf16[147,128], index: 1, kind: input, shape index: {}]   ;;  %s2187_s2 = inlined_call_operand.vmem [shape: f32[1,128], index: 2, kind: input, shape index: {}]   ;;  %s2188_s3 = inlined_call_operand.hbm [shape: bf16[512,128], index: 3, kind: output, shape index: {}]  }
   0x1   :  { %v1695_v0 = vld [vmem:[%s2186_s1] sm:$0xff]   ;;  %555 = vmatprep.subr.bf16.mxu0 %v1825_v1  ;;  %1670 = vmatprep.subr.bf16.mxu1 %v1825_v1  ;;  %v1696_v2 = vld [vmem:[%s2186_s1 + $0x8] sm:$0xff]   ;;  %v1697_v3 = vld [vmem:[%s2186_s1 + $0x10] sm:$0xff]   ;;  %v1826_v11 = vmov 65535  }
   0x2   :  { %556 = vmatpush1.bf16.msra.mxu0 %v1695_v0  ;;  %1680 = vmatpush1.bf16.msra.mxu1 %v1695_v0  ;;  %v1698_v4 = vld [vmem:[%s2186_s1 + $0x18] sm:$0xff]   ;;  %v1707_v5 = vld [vmem:[%s2185_s0 + $0x4] ss:$8 sps:$4 sm:$0xff]   ;;  %v1701_v9 = vld [vmem:[%s2186_s1 + $0x30] sm:$0xff]   ;;  %v550_v12 = vsel %vm548_vm1, 4294967295, %v1826_v11 }
   0x3   :  { %557 = vmatprep.subr.bf16.mxu0 %v1825_v1  ;;  %1671 = vmatprep.subr.bf16.mxu1 %v1825_v1  ;;  %v1710_v6 = vld [vmem:[%s2185_s0 + $0x104] ss:$8 sps:$4 sm:$0xff]   ;;  %v1702_v10 = vld [vmem:[%s2186_s1 + $0x38] sm:$0xff]   ;;  %v1704_v14 = vld [vmem:[%s2186_s1 + $0x48] ss:$0 sps:$4 sm:$0x33]  }
   0x4   :  { %1319 = vmatprep.mubr.msk.bf16.mxu0 %vm451_vm0, %v1707_v5  ;;  %v1699_v7 = vld [vmem:[%s2186_s1 + $0x20] sm:$0xff]   ;;  %1335 = vmatprep.mubr.msk.bf16.mxu1 %vm451_vm0, %v1710_v6  ;;  %v1700_v8 = vld [vmem:[%s2186_s1 + $0x28] sm:$0xff]   ;;  %v551_v15 = vsel %vm549_vm2, %v550_v12, 0  ;;  %v1711_v19 = vld [vmem:[%s2185_s0 + $0x14] ss:$8 sps:$4 sm:$0xff]  }
   0x5   :  { %v1703_v13 = vld [vmem:[%s2186_s1 + $0x40] sm:$0xff]   ;;  %v553_v16 = vand.u32 %v1704_v14, %v551_v15  ;;  %v1713_v20 = vld [vmem:[%s2185_s0 + $0x114] ss:$8 sps:$4 sm:$0xff]   ;;  %v1715_v21 = vld [vmem:[%s2185_s0 + $0x10] ss:$8 sps:$4 sm:$0xff]  }
   0x6   :  { %558 = vmatpush1.bf16.msra.mxu0 %v1696_v2  ;;  %1681 = vmatpush1.bf16.msra.mxu1 %v1696_v2  ;;  %v1705_v17 = vld [vmem:[%s2185_s0] ss:$8 sps:$4 sm:$0xff]   ;;  %v1716_v22 = vld [vmem:[%s2185_s0 + $0x110] ss:$8 sps:$4 sm:$0xff]   ;;  %v1717_v23 = vld [vmem:[%s2185_s0 + $0x24] ss:$8 sps:$4 sm:$0xff]  }
   0x7   :  { %559 = vmatprep.subr.bf16.mxu0 %v1825_v1  ;;  %1672 = vmatprep.subr.bf16.mxu1 %v1825_v1  ;;  %v1708_v18 = vld [vmem:[%s2185_s0 + $0x100] ss:$8 sps:$4 sm:$0xff]   ;;  %v1719_v24 = vld [vmem:[%s2185_s0 + $0x124] ss:$8 sps:$4 sm:$0xff]  }
   0xa   :  { %560 = vmatpush1.bf16.msra.mxu0 %v1697_v3  ;;  %1682 = vmatpush1.bf16.msra.mxu1 %v1697_v3 }
   0xb   :  { %561 = vmatprep.subr.bf16.mxu0 %v1825_v1  ;;  %1673 = vmatprep.subr.bf16.mxu1 %v1825_v1 }
   0xe   :  { %562 = vmatpush1.bf16.msra.mxu0 %v1698_v4  ;;  %1683 = vmatpush1.bf16.msra.mxu1 %v1698_v4 }
   0xf   :  { %563 = vmatprep.subr.bf16.mxu0 %v1825_v1  ;;  %1674 = vmatprep.subr.bf16.mxu1 %v1825_v1 }
  0x12   :  { %564 = vmatpush1.bf16.msra.mxu0 %v1699_v7  ;;  %1684 = vmatpush1.bf16.msra.mxu1 %v1699_v7 }
  0x13   :  { %565 = vmatprep.subr.bf16.mxu0 %v1825_v1  ;;  %1675 = vmatprep.subr.bf16.mxu1 %v1825_v1 }
  0x16   :  { %566 = vmatpush1.bf16.msra.mxu0 %v1700_v8  ;;  %1685 = vmatpush1.bf16.msra.mxu1 %v1700_v8 }
  0x17   :  { %567 = vmatprep.subr.bf16.mxu0 %v1825_v1  ;;  %1676 = vmatprep.subr.bf16.mxu1 %v1825_v1 }
  0x1a   :  { %568 = vmatpush1.bf16.msra.mxu0 %v1701_v9  ;;  %1686 = vmatpush1.bf16.msra.mxu1 %v1701_v9 }
  0x1b   :  { %569 = vmatprep.subr.bf16.mxu0 %v1825_v1  ;;  %1677 = vmatprep.subr.bf16.mxu1 %v1825_v1 }
  0x1e   :  { %570 = vmatpush1.bf16.msra.mxu0 %v1702_v10  ;;  %1687 = vmatpush1.bf16.msra.mxu1 %v1702_v10 }
  0x1f   :  { %571 = vmatprep.subr.bf16.mxu0 %v1825_v1  ;;  %1678 = vmatprep.subr.bf16.mxu1 %v1825_v1 }
  0x22   :  { %572 = vmatpush1.bf16.msra.mxu0 %v1703_v13  ;;  %1688 = vmatpush1.bf16.msra.mxu1 %v1703_v13 }
  0x23   :  { %573 = vmatprep.subr.bf16.mxu0 %v1825_v1  ;;  %1679 = vmatprep.subr.bf16.mxu1 %v1825_v1 }
  0x26   :  { %574 = vmatpush1.bf16.msra.mxu0 %v553_v16  ;;  %1689 = vmatpush1.bf16.msra.mxu1 %v553_v16 }
  0x29   :  { %588 = vmatmul.mubr.bf16.vlgmr.msra.gmra.mrb[0].mxu0 %v1705_v17  ;;  %716 = vmatmul.mubr.bf16.vlgmr.msra.gmra.mrb[0].mxu1 %v1708_v18 }
  0x2a   :  { %1320 = vmatprep.mubr.msk.bf16.mxu0 %vm451_vm0, %v1711_v19  ;;  %1336 = vmatprep.mubr.msk.bf16.mxu1 %vm451_vm0, %v1713_v20 }
  0x31   :  { %596 = vmatmul.mubr.bf16.gmra.mrb[4].mxu0 %v1715_v21  ;;  %724 = vmatmul.mubr.bf16.gmra.mrb[4].mxu1 %v1716_v22 }
  0x32   :  { %1321 = vmatprep.mubr.msk.bf16.mxu0 %vm451_vm0, %v1717_v23  ;;  %1337 = vmatprep.mubr.msk.bf16.mxu1 %vm451_vm0, %v1719_v24 }
  0x33   :  { %8 = vsyncpa [#allocation3], 0  ;;  %v1721_v25 = vld [vmem:[%s2185_s0 + $0x20] ss:$8 sps:$4 sm:$0xff]   ;;  %v1723_v27 = vld [vmem:[%s2185_s0 + $0x34] ss:$8 sps:$4 sm:$0xff]  }
  0x34   :  { %v1722_v26 = vld [vmem:[%s2185_s0 + $0x120] ss:$8 sps:$4 sm:$0xff]   ;;  %v1725_v28 = vld [vmem:[%s2185_s0 + $0x134] ss:$8 sps:$4 sm:$0xff]   ;;  %v1727_v29 = vld [vmem:[%s2185_s0 + $0x30] ss:$8 sps:$4 sm:$0xff]  }
  0x35   :  { %v1728_v30 = vld [vmem:[%s2185_s0 + $0x130] ss:$8 sps:$4 sm:$0xff]   ;;  %v1729_v31 = vld [vmem:[%s2185_s0 + $0x44] ss:$8 sps:$4 sm:$0xff]   ;;  %v1733_v33 = vld [vmem:[%s2185_s0 + $0x40] ss:$8 sps:$4 sm:$0xff]  }
  0x36   :  { %v1731_v32 = vld [vmem:[%s2185_s0 + $0x144] ss:$8 sps:$4 sm:$0xff]   ;;  %v1734_v34 = vld [vmem:[%s2185_s0 + $0x140] ss:$8 sps:$4 sm:$0xff]   ;;  %v1735_v35 = vld [vmem:[%s2185_s0 + $0x54] ss:$8 sps:$4 sm:$0xff]  }
  0x37   :  { %v1737_v36 = vld [vmem:[%s2185_s0 + $0x154] ss:$8 sps:$4 sm:$0xff]   ;;  %v1739_v37 = vld [vmem:[%s2185_s0 + $0x50] ss:$8 sps:$4 sm:$0xff]   ;;  %v1741_v39 = vld [vmem:[%s2185_s0 + $0x64] ss:$8 sps:$4 sm:$0xff]  }
  0x38   :  { %v1740_v38 = vld [vmem:[%s2185_s0 + $0x150] ss:$8 sps:$4 sm:$0xff]   ;;  %v1743_v40 = vld [vmem:[%s2185_s0 + $0x164] ss:$8 sps:$4 sm:$0xff]   ;;  %v1745_v41 = vld [vmem:[%s2185_s0 + $0x60] ss:$8 sps:$4 sm:$0xff]  }
  0x39   :  { %604 = vmatmul.mubr.bf16.gmra.mrb[8].mxu0 %v1721_v25  ;;  %732 = vmatmul.mubr.bf16.gmra.mrb[8].mxu1 %v1722_v26  ;;  %v1746_v42 = vld [vmem:[%s2185_s0 + $0x160] ss:$8 sps:$4 sm:$0xff]   ;;  %v1747_v43 = vld [vmem:[%s2185_s0 + $0x74] ss:$8 sps:$4 sm:$0xff]   ;;  %v1751_v45 = vld [vmem:[%s2185_s0 + $0x70] ss:$8 sps:$4 sm:$0xff]  }
  0x3a   :  { %1322 = vmatprep.mubr.msk.bf16.mxu0 %vm451_vm0, %v1723_v27  ;;  %1338 = vmatprep.mubr.msk.bf16.mxu1 %vm451_vm0, %v1725_v28  ;;  %v1749_v44 = vld [vmem:[%s2185_s0 + $0x174] ss:$8 sps:$4 sm:$0xff]   ;;  %v1752_v46 = vld [vmem:[%s2185_s0 + $0x170] ss:$8 sps:$4 sm:$0xff]   ;;  %v1753_v47 = vld [vmem:[%s2185_s0 + $0x84] ss:$8 sps:$4 sm:$0xff]  }
  0x3b   :  { %v1755_v48 = vld [vmem:[%s2185_s0 + $0x184] ss:$8 sps:$4 sm:$0xff]   ;;  %v1757_v49 = vld [vmem:[%s2185_s0 + $0x80] ss:$8 sps:$4 sm:$0xff]   ;;  %v1759_v51 = vld [vmem:[%s2185_s0 + $0x94] ss:$8 sps:$4 sm:$0xff]  }
  0x3c   :  { %v1758_v50 = vld [vmem:[%s2185_s0 + $0x180] ss:$8 sps:$4 sm:$0xff]   ;;  %v1761_v52 = vld [vmem:[%s2185_s0 + $0x194] ss:$8 sps:$4 sm:$0xff]   ;;  %v1763_v53 = vld [vmem:[%s2185_s0 + $0x90] ss:$8 sps:$4 sm:$0xff]  }
  0x3d   :  { %v1764_v54 = vld [vmem:[%s2185_s0 + $0x190] ss:$8 sps:$4 sm:$0xff]   ;;  %v1765_v55 = vld [vmem:[%s2185_s0 + $0xa4] ss:$8 sps:$4 sm:$0xff]   ;;  %v1769_v57 = vld [vmem:[%s2185_s0 + $0xa0] ss:$8 sps:$4 sm:$0xff]  }
  0x3e   :  { %v1767_v56 = vld [vmem:[%s2185_s0 + $0x1a4] ss:$8 sps:$4 sm:$0xff]   ;;  %v1770_v58 = vld [vmem:[%s2185_s0 + $0x1a0] ss:$8 sps:$4 sm:$0xff]   ;;  %v1771_v59 = vld [vmem:[%s2185_s0 + $0xb4] ss:$8 sps:$4 sm:$0xff]  }
  0x3f   :  { %v1773_v60 = vld [vmem:[%s2185_s0 + $0x1b4] ss:$8 sps:$4 sm:$0xff]   ;;  %v1775_v61 = vld [vmem:[%s2185_s0 + $0xb0] ss:$8 sps:$4 sm:$0xff]   ;;  %v1777_v63 = vld [vmem:[%s2185_s0 + $0xc4] ss:$8 sps:$4 sm:$0xff]  }
  0x40   :  { %v1776_v62 = vld [vmem:[%s2185_s0 + $0x1b0] ss:$8 sps:$4 sm:$0xff]   ;;  %v1779_v0 = vld [vmem:[%s2185_s0 + $0x1c4] ss:$8 sps:$4 sm:$0xff]   ;;  %v1781_v1 = vld [vmem:[%s2185_s0 + $0xc0] ss:$8 sps:$4 sm:$0xff]  }
  0x41   :  { %612 = vmatmul.mubr.bf16.gmra.mrb[12].mxu0 %v1727_v29  ;;  %740 = vmatmul.mubr.bf16.gmra.mrb[12].mxu1 %v1728_v30  ;;  %v1782_v2 = vld [vmem:[%s2185_s0 + $0x1c0] ss:$8 sps:$4 sm:$0xff]   ;;  %v1783_v3 = vld [vmem:[%s2185_s0 + $0xd4] ss:$8 sps:$4 sm:$0xff]   ;;  %v1787_v5 = vld [vmem:[%s2185_s0 + $0xd0] ss:$8 sps:$4 sm:$0xff]  }
  0x42   :  { %1323 = vmatprep.mubr.msk.bf16.mxu0 %vm451_vm0, %v1729_v31  ;;  %1339 = vmatprep.mubr.msk.bf16.mxu1 %vm451_vm0, %v1731_v32  ;;  %v1785_v4 = vld [vmem:[%s2185_s0 + $0x1d4] ss:$8 sps:$4 sm:$0xff]   ;;  %v1788_v6 = vld [vmem:[%s2185_s0 + $0x1d0] ss:$8 sps:$4 sm:$0xff]   ;;  %v1789_v7 = vld [vmem:[%s2185_s0 + $0xe4] ss:$8 sps:$4 sm:$0xff]  }
  0x43   :  { %v1791_v8 = vld [vmem:[%s2185_s0 + $0x1e4] ss:$8 sps:$4 sm:$0xff]   ;;  %v1793_v9 = vld [vmem:[%s2185_s0 + $0xe0] ss:$8 sps:$4 sm:$0xff]   ;;  %v1795_v11 = vld [vmem:[%s2185_s0 + $0xf4] ss:$8 sps:$4 sm:$0xff]  }
  0x44   :  { %v1794_v10 = vld [vmem:[%s2185_s0 + $0x1e0] ss:$8 sps:$4 sm:$0xff]   ;;  %v1797_v12 = vld [vmem:[%s2185_s0 + $0x1f4] ss:$8 sps:$4 sm:$0xff]   ;;  %v1799_v13 = vld [vmem:[%s2185_s0 + $0xf0] ss:$8 sps:$4 sm:$0xff]  }
  0x45   :  { %v1800_v14 = vld [vmem:[%s2185_s0 + $0x1f0] ss:$8 sps:$4 sm:$0xff]   ;;  %v2107_v15 = vld [vmem:[%s2187_s2] ss:$0 sm:$0xff]  ;;  %s1827_s0 = smov [#allocation2]  }
  0x46   :  { %s1233_s2 = sshll.u32 %s1827_s0, 4  ;;  %s1234_s2 = int_to_ptr.vmem [resolvable:$true] %s1233_s2 }
  0x47   :  { %s1801_s22 = scalar_lea.vmem %s1234_s2, 4096  ;;  %p1806_p1 = scmp.lt.s32.totalorder %s1234_s2, %s1234_s2 }
  0x48   :  { %p1802_p0 = scmp.ne.s32.totalorder %s1234_s2, %s1801_s22  ;;  %p1807_p2 = scmp.lt.s32.totalorder %s1801_s22, %s1801_s22 }
  0x49   :  { %620 = vmatmul.mubr.bf16.gmra.mrb[16].mxu0 %v1733_v33  ;;  %748 = vmatmul.mubr.bf16.gmra.mrb[16].mxu1 %v1734_v34 }
  0x4a   :  { %1324 = vmatprep.mubr.msk.bf16.mxu0 %vm451_vm0, %v1735_v35  ;;  %1340 = vmatprep.mubr.msk.bf16.mxu1 %vm451_vm0, %v1737_v36  ;;  %p1808_p3 = por %p1807_p2, %p1806_p1 }
  0x4c   :  { %p1809_p4 = pnand %p1808_p3, %p1802_p0 }
  0x51   :  { %628 = vmatmul.mubr.bf16.gmra.mrb[20].mxu0 %v1739_v37  ;;  %756 = vmatmul.mubr.bf16.gmra.mrb[20].mxu1 %v1740_v38 }
  0x52   :  { %1325 = vmatprep.mubr.msk.bf16.mxu0 %vm451_vm0, %v1741_v39  ;;  %1341 = vmatprep.mubr.msk.bf16.mxu1 %vm451_vm0, %v1743_v40 }
  0x59   :  { %636 = vmatmul.mubr.bf16.gmra.mrb[24].mxu0 %v1745_v41  ;;  %764 = vmatmul.mubr.bf16.gmra.mrb[24].mxu1 %v1746_v42 }
  0x5a   :  { %1326 = vmatprep.mubr.msk.bf16.mxu0 %vm451_vm0, %v1747_v43  ;;  %1342 = vmatprep.mubr.msk.bf16.mxu1 %vm451_vm0, %v1749_v44 }
  0x61   :  { %644 = vmatmul.mubr.bf16.gmra.mrb[28].mxu0 %v1751_v45  ;;  %772 = vmatmul.mubr.bf16.gmra.mrb[28].mxu1 %v1752_v46 }
  0x62   :  { %1327 = vmatprep.mubr.msk.bf16.mxu0 %vm451_vm0, %v1753_v47  ;;  %1343 = vmatprep.mubr.msk.bf16.mxu1 %vm451_vm0, %v1755_v48 }
  0x69   :  { %652 = vmatmul.mubr.bf16.gmra.mrb[32].mxu0 %v1757_v49  ;;  %780 = vmatmul.mubr.bf16.gmra.mrb[32].mxu1 %v1758_v50 }
  0x6a   :  { %1328 = vmatprep.mubr.msk.bf16.mxu0 %vm451_vm0, %v1759_v51  ;;  %1344 = vmatprep.mubr.msk.bf16.mxu1 %vm451_vm0, %v1761_v52 }
  0x71   :  { %660 = vmatmul.mubr.bf16.gmra.mrb[36].mxu0 %v1763_v53  ;;  %788 = vmatmul.mubr.bf16.gmra.mrb[36].mxu1 %v1764_v54 }
  0x72   :  { %1329 = vmatprep.mubr.msk.bf16.mxu0 %vm451_vm0, %v1765_v55  ;;  %1345 = vmatprep.mubr.msk.bf16.mxu1 %vm451_vm0, %v1767_v56 }
  0x79   :  { %668 = vmatmul.mubr.bf16.gmra.mrb[40].mxu0 %v1769_v57  ;;  %796 = vmatmul.mubr.bf16.gmra.mrb[40].mxu1 %v1770_v58 }
  0x7a   :  { %1330 = vmatprep.mubr.msk.bf16.mxu0 %vm451_vm0, %v1771_v59  ;;  %1346 = vmatprep.mubr.msk.bf16.mxu1 %vm451_vm0, %v1773_v60 }
  0x81   :  { %676 = vmatmul.mubr.bf16.gmra.mrb[44].mxu0 %v1775_v61  ;;  %804 = vmatmul.mubr.bf16.gmra.mrb[44].mxu1 %v1776_v62 }
  0x82   :  { %1331 = vmatprep.mubr.msk.bf16.mxu0 %vm451_vm0, %v1777_v63  ;;  %1347 = vmatprep.mubr.msk.bf16.mxu1 %vm451_vm0, %v1779_v0 }
  0x89   :  { %684 = vmatmul.mubr.bf16.gmra.mrb[48].mxu0 %v1781_v1  ;;  %812 = vmatmul.mubr.bf16.gmra.mrb[48].mxu1 %v1782_v2 }
  0x8a   :  { %1332 = vmatprep.mubr.msk.bf16.mxu0 %vm451_vm0, %v1783_v3  ;;  %1348 = vmatprep.mubr.msk.bf16.mxu1 %vm451_vm0, %v1785_v4 }
  0x91   :  { %692 = vmatmul.mubr.bf16.gmra.mrb[52].mxu0 %v1787_v5  ;;  %820 = vmatmul.mubr.bf16.gmra.mrb[52].mxu1 %v1788_v6 }
  0x92   :  { %1333 = vmatprep.mubr.msk.bf16.mxu0 %vm451_vm0, %v1789_v7  ;;  %1349 = vmatprep.mubr.msk.bf16.mxu1 %vm451_vm0, %v1791_v8 }
  0x99   :  { %700 = vmatmul.mubr.bf16.gmra.mrb[56].mxu0 %v1793_v9  ;;  %828 = vmatmul.mubr.bf16.gmra.mrb[56].mxu1 %v1794_v10 }
  0x9a   :  { %1334 = vmatprep.mubr.msk.bf16.mxu0 %vm451_vm0, %v1795_v11  ;;  %1350 = vmatprep.mubr.msk.bf16.mxu1 %vm451_vm0, %v1797_v12 }
  0xa1   :  { %708 = vmatmul.mubr.bf16.gmra.mrb[60].mxu0 %v1799_v13  ;;  %836 = vmatmul.mubr.bf16.gmra.mrb[60].mxu1 %v1800_v14 }
  0xfc   :  { %v589_v16 = vpop.f32.mrb[0].mxu0  ;;  %v717_v17 = vpop.f32.mrb[0].mxu1 }
  0xfd   :  { %v590_v18 = vadd.f32 %v2107_v15, %v589_v16  ;;  %v718_v19 = vadd.f32 %v2107_v15, %v717_v17  ;;  %v591_v20 = vpop.f32.mrb[1].mxu0  ;;  %v719_v21 = vpop.f32.mrb[1].mxu1 }
  0xfe   :  { %v592_v22 = vpop.f32.mrb[2].mxu0  ;;  %v720_v23 = vpop.f32.mrb[2].mxu1 }
  0xff   :  { %v593_v24 = vadd.f32 %v2107_v15, %v592_v22  ;;  %v721_v25 = vadd.f32 %v2107_v15, %v720_v23  ;;  %v594_v26 = vpop.f32.mrb[3].mxu0  ;;  %v722_v27 = vpop.f32.mrb[3].mxu1  ;;  %v844_v28 = vmax.f32 %v590_v18, 0.0  ;;  %v876_v29 = vmax.f32 %v718_v19, 0.0 }
 0x101   :  { %v845_v30 = vmax.f32 %v593_v24, 0.0  ;;  %v877_v31 = vmax.f32 %v721_v25, 0.0 }
 0x103   :  { %v1482_v32 = vpack.c.bf16 %v845_v30, %v844_v28  ;;  %v1562_v33 = vpack.c.bf16 %v877_v31, %v876_v29 }
 0x104   :  { %v597_v34 = vpop.f32.mrb[4].mxu0  ;;  %v725_v35 = vpop.f32.mrb[4].mxu1 }
 0x105   :  { %1483 = vst [vmem:[#allocation2] sm:$0xff] %v1482_v32   ;;  %1654 = vst [vmem:[#allocation2 + $0x80] sm:$0xff] %v1562_v33   ;;  %v598_v36 = vadd.f32 %v2107_v15, %v597_v34  ;;  %v726_v37 = vadd.f32 %v2107_v15, %v725_v35  ;;  %v599_v38 = vpop.f32.mrb[5].mxu0  ;;  %v727_v39 = vpop.f32.mrb[5].mxu1 }
 0x106   :  { %v600_v40 = vpop.f32.mrb[6].mxu0  ;;  %v728_v41 = vpop.f32.mrb[6].mxu1 }
 0x107   :  { %v601_v42 = vadd.f32 %v2107_v15, %v600_v40  ;;  %v729_v43 = vadd.f32 %v2107_v15, %v728_v41  ;;  %v602_v44 = vpop.f32.mrb[7].mxu0  ;;  %v730_v45 = vpop.f32.mrb[7].mxu1  ;;  %v846_v46 = vmax.f32 %v598_v36, 0.0  ;;  %v878_v47 = vmax.f32 %v726_v37, 0.0 }
 0x109   :  { %v847_v48 = vmax.f32 %v601_v42, 0.0  ;;  %v879_v49 = vmax.f32 %v729_v43, 0.0 }
 0x10b   :  { %v1487_v50 = vpack.c.bf16 %v847_v48, %v846_v46  ;;  %v1567_v51 = vpack.c.bf16 %v879_v49, %v878_v47 }
 0x10c   :  { %v605_v52 = vpop.f32.mrb[8].mxu0  ;;  %v733_v53 = vpop.f32.mrb[8].mxu1 }
 0x10d   :  { %1639 = vst [vmem:[#allocation2 + $0x8] sm:$0xff] %v1487_v50   ;;  %1655 = vst [vmem:[#allocation2 + $0x88] sm:$0xff] %v1567_v51   ;;  %v606_v54 = vadd.f32 %v2107_v15, %v605_v52  ;;  %v734_v55 = vadd.f32 %v2107_v15, %v733_v53  ;;  %v607_v56 = vpop.f32.mrb[9].mxu0  ;;  %v735_v57 = vpop.f32.mrb[9].mxu1 }
 0x10e   :  { %v608_v58 = vpop.f32.mrb[10].mxu0  ;;  %v736_v59 = vpop.f32.mrb[10].mxu1 }
 0x10f   :  { %v609_v60 = vadd.f32 %v2107_v15, %v608_v58  ;;  %v737_v61 = vadd.f32 %v2107_v15, %v736_v59  ;;  %v610_v62 = vpop.f32.mrb[11].mxu0  ;;  %v738_v63 = vpop.f32.mrb[11].mxu1  ;;  %v848_v0 = vmax.f32 %v606_v54, 0.0  ;;  %v880_v1 = vmax.f32 %v734_v55, 0.0 }
 0x111   :  { %v849_v2 = vmax.f32 %v609_v60, 0.0  ;;  %v881_v3 = vmax.f32 %v737_v61, 0.0 }
 0x113   :  { %v1492_v4 = vpack.c.bf16 %v849_v2, %v848_v0  ;;  %v1572_v5 = vpack.c.bf16 %v881_v3, %v880_v1 }
 0x114   :  { %v613_v6 = vpop.f32.mrb[12].mxu0  ;;  %v741_v7 = vpop.f32.mrb[12].mxu1 }
 0x115   :  { %1640 = vst [vmem:[#allocation2 + $0x10] sm:$0xff] %v1492_v4   ;;  %1656 = vst [vmem:[#allocation2 + $0x90] sm:$0xff] %v1572_v5   ;;  %v614_v8 = vadd.f32 %v2107_v15, %v613_v6  ;;  %v742_v9 = vadd.f32 %v2107_v15, %v741_v7  ;;  %v615_v10 = vpop.f32.mrb[13].mxu0  ;;  %v743_v11 = vpop.f32.mrb[13].mxu1 }
 0x116   :  { %v616_v12 = vpop.f32.mrb[14].mxu0  ;;  %v744_v13 = vpop.f32.mrb[14].mxu1 }
 0x117   :  { %v617_v14 = vadd.f32 %v2107_v15, %v616_v12  ;;  %v745_v16 = vadd.f32 %v2107_v15, %v744_v13  ;;  %v618_v17 = vpop.f32.mrb[15].mxu0  ;;  %v746_v18 = vpop.f32.mrb[15].mxu1  ;;  %v850_v19 = vmax.f32 %v614_v8, 0.0  ;;  %v882_v20 = vmax.f32 %v742_v9, 0.0 }
 0x119   :  { %v851_v21 = vmax.f32 %v617_v14, 0.0  ;;  %v883_v22 = vmax.f32 %v745_v16, 0.0 }
 0x11b   :  { %v1497_v23 = vpack.c.bf16 %v851_v21, %v850_v19  ;;  %v1577_v24 = vpack.c.bf16 %v883_v22, %v882_v20 }
 0x11c   :  { %v621_v25 = vpop.f32.mrb[16].mxu0  ;;  %v749_v26 = vpop.f32.mrb[16].mxu1 }
 0x11d   :  { %1641 = vst [vmem:[#allocation2 + $0x18] sm:$0xff] %v1497_v23   ;;  %1657 = vst [vmem:[#allocation2 + $0x98] sm:$0xff] %v1577_v24   ;;  %v622_v27 = vadd.f32 %v2107_v15, %v621_v25  ;;  %v750_v28 = vadd.f32 %v2107_v15, %v749_v26  ;;  %v623_v29 = vpop.f32.mrb[17].mxu0  ;;  %v751_v30 = vpop.f32.mrb[17].mxu1 }
 0x11e   :  { %v624_v31 = vpop.f32.mrb[18].mxu0  ;;  %v752_v32 = vpop.f32.mrb[18].mxu1 }
 0x11f   :  { %v625_v33 = vadd.f32 %v2107_v15, %v624_v31  ;;  %v753_v34 = vadd.f32 %v2107_v15, %v752_v32  ;;  %v626_v35 = vpop.f32.mrb[19].mxu0  ;;  %v754_v36 = vpop.f32.mrb[19].mxu1  ;;  %v852_v37 = vmax.f32 %v622_v27, 0.0  ;;  %v884_v38 = vmax.f32 %v750_v28, 0.0 }
 0x121   :  { %v853_v39 = vmax.f32 %v625_v33, 0.0  ;;  %v885_v40 = vmax.f32 %v753_v34, 0.0 }
 0x123   :  { %v1502_v41 = vpack.c.bf16 %v853_v39, %v852_v37  ;;  %v1582_v42 = vpack.c.bf16 %v885_v40, %v884_v38 }
 0x124   :  { %v629_v43 = vpop.f32.mrb[20].mxu0  ;;  %v757_v44 = vpop.f32.mrb[20].mxu1 }
 0x125   :  { %1642 = vst [vmem:[#allocation2 + $0x20] sm:$0xff] %v1502_v41   ;;  %1658 = vst [vmem:[#allocation2 + $0xa0] sm:$0xff] %v1582_v42   ;;  %v630_v45 = vadd.f32 %v2107_v15, %v629_v43  ;;  %v758_v46 = vadd.f32 %v2107_v15, %v757_v44  ;;  %v631_v47 = vpop.f32.mrb[21].mxu0  ;;  %v759_v48 = vpop.f32.mrb[21].mxu1 }
 0x126   :  { %v632_v49 = vpop.f32.mrb[22].mxu0  ;;  %v760_v50 = vpop.f32.mrb[22].mxu1 }
 0x127   :  { %v633_v51 = vadd.f32 %v2107_v15, %v632_v49  ;;  %v761_v52 = vadd.f32 %v2107_v15, %v760_v50  ;;  %v634_v53 = vpop.f32.mrb[23].mxu0  ;;  %v762_v54 = vpop.f32.mrb[23].mxu1  ;;  %v854_v55 = vmax.f32 %v630_v45, 0.0  ;;  %v886_v56 = vmax.f32 %v758_v46, 0.0 }
 0x129   :  { %v855_v57 = vmax.f32 %v633_v51, 0.0  ;;  %v887_v58 = vmax.f32 %v761_v52, 0.0 }
 0x12b   :  { %v1507_v59 = vpack.c.bf16 %v855_v57, %v854_v55  ;;  %v1587_v60 = vpack.c.bf16 %v887_v58, %v886_v56 }
 0x12c   :  { %v637_v61 = vpop.f32.mrb[24].mxu0  ;;  %v765_v62 = vpop.f32.mrb[24].mxu1 }
 0x12d   :  { %1643 = vst [vmem:[#allocation2 + $0x28] sm:$0xff] %v1507_v59   ;;  %1659 = vst [vmem:[#allocation2 + $0xa8] sm:$0xff] %v1587_v60   ;;  %v638_v63 = vadd.f32 %v2107_v15, %v637_v61  ;;  %v766_v0 = vadd.f32 %v2107_v15, %v765_v62  ;;  %v639_v1 = vpop.f32.mrb[25].mxu0  ;;  %v767_v2 = vpop.f32.mrb[25].mxu1 }
 0x12e   :  { %v640_v3 = vpop.f32.mrb[26].mxu0  ;;  %v768_v4 = vpop.f32.mrb[26].mxu1 }
 0x12f   :  { %v641_v5 = vadd.f32 %v2107_v15, %v640_v3  ;;  %v769_v6 = vadd.f32 %v2107_v15, %v768_v4  ;;  %v642_v7 = vpop.f32.mrb[27].mxu0  ;;  %v770_v8 = vpop.f32.mrb[27].mxu1  ;;  %v856_v9 = vmax.f32 %v638_v63, 0.0  ;;  %v888_v10 = vmax.f32 %v766_v0, 0.0 }
 0x131   :  { %v857_v11 = vmax.f32 %v641_v5, 0.0  ;;  %v889_v12 = vmax.f32 %v769_v6, 0.0 }
 0x133   :  { %v1512_v13 = vpack.c.bf16 %v857_v11, %v856_v9  ;;  %v1592_v14 = vpack.c.bf16 %v889_v12, %v888_v10 }
 0x134   :  { %v645_v16 = vpop.f32.mrb[28].mxu0  ;;  %v773_v17 = vpop.f32.mrb[28].mxu1 }
 0x135   :  { %1644 = vst [vmem:[#allocation2 + $0x30] sm:$0xff] %v1512_v13   ;;  %1660 = vst [vmem:[#allocation2 + $0xb0] sm:$0xff] %v1592_v14   ;;  %v646_v18 = vadd.f32 %v2107_v15, %v645_v16  ;;  %v774_v19 = vadd.f32 %v2107_v15, %v773_v17  ;;  %v647_v20 = vpop.f32.mrb[29].mxu0  ;;  %v775_v21 = vpop.f32.mrb[29].mxu1 }
 0x136   :  { %v648_v22 = vpop.f32.mrb[30].mxu0  ;;  %v776_v23 = vpop.f32.mrb[30].mxu1 }
 0x137   :  { %v649_v24 = vadd.f32 %v2107_v15, %v648_v22  ;;  %v777_v25 = vadd.f32 %v2107_v15, %v776_v23  ;;  %v650_v26 = vpop.f32.mrb[31].mxu0  ;;  %v778_v27 = vpop.f32.mrb[31].mxu1  ;;  %v858_v28 = vmax.f32 %v646_v18, 0.0  ;;  %v890_v29 = vmax.f32 %v774_v19, 0.0 }
 0x139   :  { %v859_v30 = vmax.f32 %v649_v24, 0.0  ;;  %v891_v31 = vmax.f32 %v777_v25, 0.0 }
 0x13b   :  { %v1517_v32 = vpack.c.bf16 %v859_v30, %v858_v28  ;;  %v1597_v33 = vpack.c.bf16 %v891_v31, %v890_v29 }
 0x13c   :  { %v653_v34 = vpop.f32.mrb[32].mxu0  ;;  %v781_v35 = vpop.f32.mrb[32].mxu1 }
 0x13d   :  { %1645 = vst [vmem:[#allocation2 + $0x38] sm:$0xff] %v1517_v32   ;;  %1661 = vst [vmem:[#allocation2 + $0xb8] sm:$0xff] %v1597_v33   ;;  %v654_v36 = vadd.f32 %v2107_v15, %v653_v34  ;;  %v782_v37 = vadd.f32 %v2107_v15, %v781_v35  ;;  %v655_v38 = vpop.f32.mrb[33].mxu0  ;;  %v783_v39 = vpop.f32.mrb[33].mxu1 }
 0x13e   :  { %v656_v40 = vpop.f32.mrb[34].mxu0  ;;  %v784_v41 = vpop.f32.mrb[34].mxu1 }
 0x13f   :  { %v657_v42 = vadd.f32 %v2107_v15, %v656_v40  ;;  %v785_v43 = vadd.f32 %v2107_v15, %v784_v41  ;;  %v658_v44 = vpop.f32.mrb[35].mxu0  ;;  %v786_v45 = vpop.f32.mrb[35].mxu1  ;;  %v860_v46 = vmax.f32 %v654_v36, 0.0  ;;  %v892_v47 = vmax.f32 %v782_v37, 0.0 }
 0x141   :  { %v861_v48 = vmax.f32 %v657_v42, 0.0  ;;  %v893_v49 = vmax.f32 %v785_v43, 0.0 }
 0x143   :  { %v1522_v50 = vpack.c.bf16 %v861_v48, %v860_v46  ;;  %v1602_v51 = vpack.c.bf16 %v893_v49, %v892_v47 }
 0x144   :  { %v661_v52 = vpop.f32.mrb[36].mxu0  ;;  %v789_v53 = vpop.f32.mrb[36].mxu1 }
 0x145   :  { %1646 = vst [vmem:[#allocation2 + $0x40] sm:$0xff] %v1522_v50   ;;  %1662 = vst [vmem:[#allocation2 + $0xc0] sm:$0xff] %v1602_v51   ;;  %v662_v54 = vadd.f32 %v2107_v15, %v661_v52  ;;  %v790_v55 = vadd.f32 %v2107_v15, %v789_v53  ;;  %v663_v56 = vpop.f32.mrb[37].mxu0  ;;  %v791_v57 = vpop.f32.mrb[37].mxu1 }
 0x146   :  { %v664_v58 = vpop.f32.mrb[38].mxu0  ;;  %v792_v59 = vpop.f32.mrb[38].mxu1 }
 0x147   :  { %v665_v60 = vadd.f32 %v2107_v15, %v664_v58  ;;  %v793_v61 = vadd.f32 %v2107_v15, %v792_v59  ;;  %v666_v62 = vpop.f32.mrb[39].mxu0  ;;  %v794_v63 = vpop.f32.mrb[39].mxu1  ;;  %v862_v0 = vmax.f32 %v662_v54, 0.0  ;;  %v894_v1 = vmax.f32 %v790_v55, 0.0 }
 0x149   :  { %v863_v2 = vmax.f32 %v665_v60, 0.0  ;;  %v895_v3 = vmax.f32 %v793_v61, 0.0 }
 0x14b   :  { %v1527_v4 = vpack.c.bf16 %v863_v2, %v862_v0  ;;  %v1607_v5 = vpack.c.bf16 %v895_v3, %v894_v1 }
 0x14c   :  { %v669_v6 = vpop.f32.mrb[40].mxu0  ;;  %v797_v7 = vpop.f32.mrb[40].mxu1 }
 0x14d   :  { %1647 = vst [vmem:[#allocation2 + $0x48] sm:$0xff] %v1527_v4   ;;  %1663 = vst [vmem:[#allocation2 + $0xc8] sm:$0xff] %v1607_v5   ;;  %v670_v8 = vadd.f32 %v2107_v15, %v669_v6  ;;  %v798_v9 = vadd.f32 %v2107_v15, %v797_v7  ;;  %v671_v10 = vpop.f32.mrb[41].mxu0  ;;  %v799_v11 = vpop.f32.mrb[41].mxu1 }
 0x14e   :  { %v672_v12 = vpop.f32.mrb[42].mxu0  ;;  %v800_v13 = vpop.f32.mrb[42].mxu1 }
 0x14f   :  { %v673_v14 = vadd.f32 %v2107_v15, %v672_v12  ;;  %v801_v16 = vadd.f32 %v2107_v15, %v800_v13  ;;  %v674_v17 = vpop.f32.mrb[43].mxu0  ;;  %v802_v18 = vpop.f32.mrb[43].mxu1  ;;  %v864_v19 = vmax.f32 %v670_v8, 0.0  ;;  %v896_v20 = vmax.f32 %v798_v9, 0.0 }
 0x151   :  { %v865_v21 = vmax.f32 %v673_v14, 0.0  ;;  %v897_v22 = vmax.f32 %v801_v16, 0.0 }
 0x153   :  { %v1532_v23 = vpack.c.bf16 %v865_v21, %v864_v19  ;;  %v1612_v24 = vpack.c.bf16 %v897_v22, %v896_v20 }
 0x154   :  { %v677_v25 = vpop.f32.mrb[44].mxu0  ;;  %v805_v26 = vpop.f32.mrb[44].mxu1 }
 0x155   :  { %1648 = vst [vmem:[#allocation2 + $0x50] sm:$0xff] %v1532_v23   ;;  %1664 = vst [vmem:[#allocation2 + $0xd0] sm:$0xff] %v1612_v24   ;;  %v678_v27 = vadd.f32 %v2107_v15, %v677_v25  ;;  %v806_v28 = vadd.f32 %v2107_v15, %v805_v26  ;;  %v679_v29 = vpop.f32.mrb[45].mxu0  ;;  %v807_v30 = vpop.f32.mrb[45].mxu1 }
 0x156   :  { %v680_v31 = vpop.f32.mrb[46].mxu0  ;;  %v808_v32 = vpop.f32.mrb[46].mxu1 }
 0x157   :  { %v681_v33 = vadd.f32 %v2107_v15, %v680_v31  ;;  %v809_v34 = vadd.f32 %v2107_v15, %v808_v32  ;;  %v682_v35 = vpop.f32.mrb[47].mxu0  ;;  %v810_v36 = vpop.f32.mrb[47].mxu1  ;;  %v866_v37 = vmax.f32 %v678_v27, 0.0  ;;  %v898_v38 = vmax.f32 %v806_v28, 0.0 }
 0x159   :  { %v867_v39 = vmax.f32 %v681_v33, 0.0  ;;  %v899_v40 = vmax.f32 %v809_v34, 0.0 }
 0x15b   :  { %v1537_v41 = vpack.c.bf16 %v867_v39, %v866_v37  ;;  %v1617_v42 = vpack.c.bf16 %v899_v40, %v898_v38 }
 0x15c   :  { %v685_v43 = vpop.f32.mrb[48].mxu0  ;;  %v813_v44 = vpop.f32.mrb[48].mxu1 }
 0x15d   :  { %1649 = vst [vmem:[#allocation2 + $0x58] sm:$0xff] %v1537_v41   ;;  %1665 = vst [vmem:[#allocation2 + $0xd8] sm:$0xff] %v1617_v42   ;;  %v686_v45 = vadd.f32 %v2107_v15, %v685_v43  ;;  %v814_v46 = vadd.f32 %v2107_v15, %v813_v44  ;;  %v687_v47 = vpop.f32.mrb[49].mxu0  ;;  %v815_v48 = vpop.f32.mrb[49].mxu1 }
 0x15e   :  { %v688_v49 = vpop.f32.mrb[50].mxu0  ;;  %v816_v50 = vpop.f32.mrb[50].mxu1 }
 0x15f   :  { %v689_v51 = vadd.f32 %v2107_v15, %v688_v49  ;;  %v817_v52 = vadd.f32 %v2107_v15, %v816_v50  ;;  %v690_v53 = vpop.f32.mrb[51].mxu0  ;;  %v818_v54 = vpop.f32.mrb[51].mxu1  ;;  %v868_v55 = vmax.f32 %v686_v45, 0.0  ;;  %v900_v56 = vmax.f32 %v814_v46, 0.0 }
 0x161   :  { %v869_v57 = vmax.f32 %v689_v51, 0.0  ;;  %v901_v58 = vmax.f32 %v817_v52, 0.0 }
 0x163   :  { %v1542_v59 = vpack.c.bf16 %v869_v57, %v868_v55  ;;  %v1622_v60 = vpack.c.bf16 %v901_v58, %v900_v56 }
 0x164   :  { %v693_v61 = vpop.f32.mrb[52].mxu0  ;;  %v821_v62 = vpop.f32.mrb[52].mxu1 }
 0x165   :  { %1650 = vst [vmem:[#allocation2 + $0x60] sm:$0xff] %v1542_v59   ;;  %1666 = vst [vmem:[#allocation2 + $0xe0] sm:$0xff] %v1622_v60   ;;  %v694_v63 = vadd.f32 %v2107_v15, %v693_v61  ;;  %v822_v0 = vadd.f32 %v2107_v15, %v821_v62  ;;  %v695_v1 = vpop.f32.mrb[53].mxu0  ;;  %v823_v2 = vpop.f32.mrb[53].mxu1 }
 0x166   :  { %v696_v3 = vpop.f32.mrb[54].mxu0  ;;  %v824_v4 = vpop.f32.mrb[54].mxu1 }
 0x167   :  { %v697_v5 = vadd.f32 %v2107_v15, %v696_v3  ;;  %v825_v6 = vadd.f32 %v2107_v15, %v824_v4  ;;  %v698_v7 = vpop.f32.mrb[55].mxu0  ;;  %v826_v8 = vpop.f32.mrb[55].mxu1  ;;  %v870_v9 = vmax.f32 %v694_v63, 0.0  ;;  %v902_v10 = vmax.f32 %v822_v0, 0.0 }
 0x169   :  { %v871_v11 = vmax.f32 %v697_v5, 0.0  ;;  %v903_v12 = vmax.f32 %v825_v6, 0.0 }
 0x16b   :  { %v1547_v13 = vpack.c.bf16 %v871_v11, %v870_v9  ;;  %v1627_v14 = vpack.c.bf16 %v903_v12, %v902_v10 }
 0x16c   :  { %v701_v16 = vpop.f32.mrb[56].mxu0  ;;  %v829_v17 = vpop.f32.mrb[56].mxu1 }
 0x16d   :  { %1651 = vst [vmem:[#allocation2 + $0x68] sm:$0xff] %v1547_v13   ;;  %1667 = vst [vmem:[#allocation2 + $0xe8] sm:$0xff] %v1627_v14   ;;  %v702_v18 = vadd.f32 %v2107_v15, %v701_v16  ;;  %v830_v19 = vadd.f32 %v2107_v15, %v829_v17  ;;  %v703_v20 = vpop.f32.mrb[57].mxu0  ;;  %v831_v21 = vpop.f32.mrb[57].mxu1 }
 0x16e   :  { %v704_v22 = vpop.f32.mrb[58].mxu0  ;;  %v832_v23 = vpop.f32.mrb[58].mxu1 }
 0x16f   :  { %v705_v24 = vadd.f32 %v2107_v15, %v704_v22  ;;  %v833_v25 = vadd.f32 %v2107_v15, %v832_v23  ;;  %v706_v26 = vpop.f32.mrb[59].mxu0  ;;  %v834_v27 = vpop.f32.mrb[59].mxu1  ;;  %v872_v28 = vmax.f32 %v702_v18, 0.0  ;;  %v904_v29 = vmax.f32 %v830_v19, 0.0 }
 0x171   :  { %v873_v30 = vmax.f32 %v705_v24, 0.0  ;;  %v905_v31 = vmax.f32 %v833_v25, 0.0 }
 0x173   :  { %v1552_v32 = vpack.c.bf16 %v873_v30, %v872_v28  ;;  %v1632_v33 = vpack.c.bf16 %v905_v31, %v904_v29 }
 0x174   :  { %v709_v34 = vpop.f32.mrb[60].mxu0  ;;  %v837_v35 = vpop.f32.mrb[60].mxu1 }
 0x175   :  { %1652 = vst [vmem:[#allocation2 + $0x70] sm:$0xff] %v1552_v32   ;;  %1668 = vst [vmem:[#allocation2 + $0xf0] sm:$0xff] %v1632_v33   ;;  %v710_v36 = vadd.f32 %v2107_v15, %v709_v34  ;;  %v838_v37 = vadd.f32 %v2107_v15, %v837_v35  ;;  %v711_v38 = vpop.f32.mrb[61].mxu0  ;;  %v839_v39 = vpop.f32.mrb[61].mxu1 }
 0x176   :  { %v712_v40 = vpop.f32.mrb[62].mxu0  ;;  %v840_v41 = vpop.f32.mrb[62].mxu1 }
 0x177   :  { %v713_v42 = vadd.f32 %v2107_v15, %v712_v40  ;;  %v841_v43 = vadd.f32 %v2107_v15, %v840_v41  ;;  %v714_v44 = vpop.f32.mrb[63].mxu0  ;;  %v842_v45 = vpop.f32.mrb[63].mxu1  ;;  %v874_v46 = vmax.f32 %v710_v36, 0.0  ;;  %v906_v47 = vmax.f32 %v838_v37, 0.0 }
 0x179   :  { %v875_v48 = vmax.f32 %v713_v42, 0.0  ;;  %v907_v49 = vmax.f32 %v841_v43, 0.0 }
 0x17b   :  { %v1557_v50 = vpack.c.bf16 %v875_v48, %v874_v46  ;;  %v1637_v51 = vpack.c.bf16 %v907_v49, %v906_v47 }
 0x17d   :  { %1653 = vst [vmem:[#allocation2 + $0x78] sm:$0xff] %v1557_v50   ;;  %1669 = vst [vmem:[#allocation2 + $0xf8] sm:$0xff] %v1637_v51  }
 0x17e   :  { %1812 = shalt.err (!%p1809_p4)
}
 0x17f   :  { %s1813_s25 = scalar_lea.hbm %s2188_s3, 4096 }
 0x180   :  { %p1814_p5 = scmp.ne.s32.totalorder %s2188_s3, %s1813_s25  ;;  %p1817_p6 = scmp.lt.u32.totalorder %s1813_s25, %s2188_s3 }
 0x182   :  { %p1819_p7 = pnand %p1817_p6, %p1814_p5 }
 0x184   :  { %1822 = shalt.err (!%p1819_p7)
}
 0x185   :  { %s1828_s30 = smov 64   ;;  %s1829_s4 = smov 4  }
 0x186   :  { %1239 = dma.vmem_to_hbm [thread:$0]  %s1234_s2, 4096, %s2188_s3, [#allocation3], %s1828_s30, %s1828_s30, %s1829_s4  }
 0x187   :  { %1823 = dma.done.wait [#allocation3], 4096  }
 0x188   :  { %1824 = vsyncadd [#allocation3], 4294963200 }
 0x189   :  { %1243 = vsyncpa [#allocation3], 1 }

</bundles_post_ra>
